<compile_context>
chip_gen: v6e
topology: v6e:2x2x1
jax: 0.10.0
libtpu: 0.0.40
codegen_flags: <defaults>
</compile_context>

<pallas_src>
import functools

import jax
import jax.numpy as jnp
import numpy as np
from jax.experimental import pallas as pl
from jax.experimental.pallas import tpu as pltpu


def _l_to_all_m_expand_index(lmax: int) -> np.ndarray:
    """expand_index[i] = l for each of the (lmax+1)**2 sphere-basis entries."""
    idx = np.zeros((lmax + 1) ** 2, dtype=np.int32)
    for l in range(lmax + 1):
        idx[l * l:l * l + (2 * l + 1)] = l
    return idx


def _eqv_rmsnorm_kernel(x_ref, w_ref, o_ref, *, inv_count, eps):
    # x_ref: (bn, S*C) or (bn, S, C); w_ref: (1, S*C) or (1, S, C); o_ref like x_ref.
    x = x_ref[...].astype(jnp.float32)
    red_axes = tuple(range(1, x.ndim))
    ssq = jnp.sum(x * x, axis=red_axes, keepdims=True)            # (bn, 1[, 1])
    inv = jax.lax.rsqrt(ssq * inv_count + eps)                    # (bn, 1[, 1])
    # (x * inv) first keeps the per-row scalar broadcast cheap; no (bn, S*C)
    # f32 "scale" outer-product temporary is formed.
    o_ref[...] = ((x * inv) * w_ref[...].astype(jnp.float32)).astype(o_ref.dtype)


def _default_target_workset_bytes() -> int:
    """Per-step f32 working-set target. ~8 MiB on v6e/v7x (fast HBM, amortize
    per-step overhead); ~4 MiB on v5e (slow HBM, bigger tiles buy nothing)."""
    try:
        kind = jax.devices()[0].device_kind.lower()
    except Exception:
        kind = ""
    if ("v5 lite" in kind) or ("v5e" in kind) or ("v5litepod" in kind):
        return 4 << 20
    return 8 << 20


def _choose_block_n(n_rows: int, row_bytes: int, sc: int,
                    target_f32_workset_bytes: int) -> int:
    """Row-block size: multiple of 8, sized so the f32 working set per step is
    ~target, megacore split only when there is enough total work."""
    row_f32_bytes = sc * 4
    cap = max(8, (target_f32_workset_bytes // max(row_f32_bytes, 1)) // 8 * 8)
    n_up8 = max(8, pl.cdiv(n_rows, 8) * 8)
    bn = min(cap, n_up8)
    total_bytes = n_rows * row_bytes
    # v7x megacore: only split a single-block problem across 2 TensorCores when
    # the total work is big enough to pay the per-core pipeline overhead.
    if bn >= n_up8 and n_up8 > 8 and total_bytes > (4 << 20):
        bn = pl.cdiv(pl.cdiv(n_up8, 2), 8) * 8
    return int(bn)


def equivariant_rmsnorm_sh(
    x,                      # (N, S, C) with S = (lmax+1)**2
    affine_weight=None,     # (lmax+1, C) required when affine=True
    *,
    lmax,
    eps=1e-5,
    affine=True,
    normalization="component",
    block_n=None,
    target_workset_bytes=None,
    donate_input=False,
):
    N, S, C = x.shape
    assert S == (lmax + 1) ** 2, "sphere basis dim must be (lmax+1)**2"
    assert normalization in ("norm", "component")

    # Expanded per-basis affine weights.
    if affine:
        assert affine_weight is not None, "affine=True requires affine_weight"
        expand_index = jnp.asarray(_l_to_all_m_expand_index(lmax))
        w_exp = jnp.asarray(affine_weight, jnp.float32)[expand_index]   # (S, C)
    else:
        w_exp = jnp.ones((S, C), jnp.float32)

    SC = S * C
    # mean over basis ('component') and mean over channels folded into 1/count.
    inv_count = (1.0 / SC) if normalization == "component" else (1.0 / C)

    if target_workset_bytes is None:
        target_workset_bytes = _default_target_workset_bytes()

    itemsize = jnp.dtype(x.dtype).itemsize
    row_bytes = SC * itemsize
    bn = block_n if block_n is not None else _choose_block_n(
        N, row_bytes, SC, target_workset_bytes)
    grid = (pl.cdiv(N, bn),)   # ragged edge block is clipped by Pallas

    # VMEM budget: double-buffered in+out pipeline tiles in the input dtype,
    # plus the in-kernel f32 working set (x upcast + one product temp).
    tile_in_bytes = bn * row_bytes
    f32_workspace = 2 * bn * SC * 4
    vmem_limit = int(min(100 << 20,
                         max(16 << 20, 4 * tile_in_bytes + f32_workspace + (2 << 20))))

    cost = pl.CostEstimate(
        flops=int(3 * N * SC),
        transcendentals=int(N),
        bytes_accessed=int(2 * N * SC * itemsize + SC * 4),
    )
    cparams = pltpu.CompilerParams(
        dimension_semantics=("parallel",),
        vmem_limit_bytes=vmem_limit,
    )
    kernel = functools.partial(_eqv_rmsnorm_kernel, inv_count=inv_count, eps=eps)

    # Lane-density: prefer a single flattened S*C lane axis (row-major reshape
    # is free).  If S*C is not a multiple of 128 but C is, keep 3-D blocks so
    # the lane axis (C) stays dense and stores stay unmasked.
    use_3d = (SC % 128 != 0) and (C % 128 == 0)

    if use_3d:
        out = pl.pallas_call(
            kernel,
            out_shape=jax.ShapeDtypeStruct((N, S, C), x.dtype),
            grid=grid,
            in_specs=[
                pl.BlockSpec((bn, S, C), lambda i: (i, 0, 0)),
                pl.BlockSpec((1, S, C), lambda i: (0, 0, 0)),
            ],
            out_specs=pl.BlockSpec((bn, S, C), lambda i: (i, 0, 0)),
            compiler_params=cparams,
            cost_estimate=cost,
            input_output_aliases=({0: 0} if donate_input else {}),
        )(x, w_exp.reshape(1, S, C))
        return out

    # Flattened lane-dense path (also the correct fallback when neither S*C
    # nor C is a multiple of 128 -- stores are then partially masked but the
    # result is exact).
    x_flat = x.reshape(N, SC)
    out = pl.pallas_call(
        kernel,
        out_shape=jax.ShapeDtypeStruct((N, SC), x.dtype),
        grid=grid,
        in_specs=[
            pl.BlockSpec((bn, SC), lambda i: (i, 0)),
            pl.BlockSpec((1, SC), lambda i: (0, 0)),
        ],
        out_specs=pl.BlockSpec((bn, SC), lambda i: (i, 0)),
        compiler_params=cparams,
        cost_estimate=cost,
        input_output_aliases=({0: 0} if donate_input else {}),
    )(x_flat, w_exp.reshape(1, SC))
    return out.reshape(N, S, C)


# --- pure-JAX reference (mirrors the PyTorch forward loop) -------------------
def _reference(x, affine_weight, *, lmax, eps, affine, normalization):
    feature = x.astype(jnp.float32)
    if normalization == "norm":
        fnorm = jnp.sum(feature ** 2, axis=1, keepdims=True)
    else:
        fnorm = jnp.mean(feature ** 2, axis=1, keepdims=True)
    fnorm = jnp.mean(fnorm, axis=2, keepdims=True)
    fnorm = (fnorm + eps) ** -0.5
    outs = []
    for l in range(lmax + 1):
        start, length = l * l, 2 * l + 1
        f = feature[:, start:start + length, :]
        scale = fnorm * affine_weight[l].reshape(1, 1, -1) if affine else fnorm
        outs.append(f * scale)
    return jnp.concatenate(outs, axis=1)


if __name__ == "__main__":
    lmax = 3
    num_channels = 32
    N = 22                       # not a multiple of 8 -> exercises the clipped edge block
    S = (lmax + 1) ** 2          # 16  -> S*C = 512 lane-dense

    key = jax.random.PRNGKey(0)
    x = jax.random.normal(key, (N, S, num_channels), dtype=jnp.float32)

    # deterministic, non-degenerate affine weights with the __init__ shape
    affine_weight = 1.0 + 0.01 * jnp.arange(
        (lmax + 1) * num_channels, dtype=jnp.float32).reshape(lmax + 1, num_channels)

    # default config: affine=True, normalization='component'
    out = equivariant_rmsnorm_sh(
        x, affine_weight, lmax=lmax, eps=1e-5,
        affine=True, normalization="component")
    out = jax.block_until_ready(out)
    ref = _reference(x, affine_weight, lmax=lmax, eps=1e-5,
                     affine=True, normalization="component")
    np.testing.assert_allclose(np.asarray(out), np.asarray(ref), rtol=1e-5, atol=1e-5)

    # also exercise the 'norm' normalization branch
    out_n = jax.block_until_ready(equivariant_rmsnorm_sh(
        x, affine_weight, lmax=lmax, eps=1e-5, affine=True, normalization="norm"))
    ref_n = _reference(x, affine_weight, lmax=lmax, eps=1e-5,
                       affine=True, normalization="norm")
    np.testing.assert_allclose(np.asarray(out_n), np.asarray(ref_n), rtol=1e-5, atol=1e-5)

    # exercise the 3-D (bn, S, C) lane-dense path (S*C % 128 != 0, C % 128 == 0)
    lmax2, C2 = 2, 128
    S2 = (lmax2 + 1) ** 2
    x2 = jax.random.normal(jax.random.PRNGKey(1), (13, S2, C2), dtype=jnp.float32)
    w2 = 1.0 + 0.01 * jnp.arange((lmax2 + 1) * C2, dtype=jnp.float32).reshape(lmax2 + 1, C2)
    out2 = jax.block_until_ready(equivariant_rmsnorm_sh(
        x2, w2, lmax=lmax2, eps=1e-5, affine=True, normalization="component"))
    ref2 = _reference(x2, w2, lmax=lmax2, eps=1e-5, affine=True, normalization="component")
    np.testing.assert_allclose(np.asarray(out2), np.asarray(ref2), rtol=1e-5, atol=1e-5)

    print("KERNEL_OK")
</pallas_src>

<mosaic_0001>
module attributes {stable_mosaic.version = 11 : i64} {
  func.func @_eqv_rmsnorm_kernel(%arg0: i32, %arg1: memref<24x512xf32, #tpu.memory_space<vmem>>, %arg2: memref<1x512xf32, #tpu.memory_space<vmem>>, %arg3: memref<24x512xf32, #tpu.memory_space<vmem>>) attributes {dimension_semantics = [#tpu.dimension_semantics<parallel>], iteration_bounds = array<i64: 1>, scalar_prefetch = 0 : i64, scratch_operands = 0 : i64, tpu.core_type = #tpu.core_type<tc>, window_params = [{transform_indices = @transform_0, window_bounds = array<i64: 24, 512>}, {pipeline_mode = #tpu.pipeline_mode<synchronous>, transform_indices = @transform_1, window_bounds = array<i64: 1, 512>}, {transform_indices = @transform_2, window_bounds = array<i64: 24, 512>}]} {
    %c0 = arith.constant 0 : index
    %c0_0 = arith.constant 0 : index
    %0 = vector.load %arg1[%c0, %c0_0] : memref<24x512xf32, #tpu.memory_space<vmem>>, vector<24x512xf32>
    %1 = arith.mulf %0, %0 : vector<24x512xf32>
    %cst = arith.constant dense<0.000000e+00> : vector<24xf32>
    %2 = vector.multi_reduction <add>, %1, %cst [1] : vector<24x512xf32> to vector<24xf32>
    %3 = vector.shape_cast %2 : vector<24xf32> to vector<24x1xf32>
    %cst_1 = arith.constant 0.001953125 : f32
    %4 = vector.broadcast %cst_1 : f32 to vector<24x1xf32>
    %5 = arith.mulf %3, %4 : vector<24x1xf32>
    %cst_2 = arith.constant 9.99999974E-6 : f32
    %6 = vector.broadcast %cst_2 : f32 to vector<24x1xf32>
    %7 = arith.addf %5, %6 : vector<24x1xf32>
    %8 = math.rsqrt %7 : vector<24x1xf32>
    %9 = vector.broadcast %8 : vector<24x1xf32> to vector<24x512xf32>
    %10 = arith.mulf %0, %9 : vector<24x512xf32>
    %c0_3 = arith.constant 0 : index
    %c0_4 = arith.constant 0 : index
    %11 = vector.load %arg2[%c0_3, %c0_4] : memref<1x512xf32, #tpu.memory_space<vmem>>, vector<1x512xf32>
    %12 = vector.broadcast %11 : vector<1x512xf32> to vector<24x512xf32>
    %13 = arith.mulf %10, %12 : vector<24x512xf32>
    %c0_5 = arith.constant 0 : index
    %c0_6 = arith.constant 0 : index
    %14 = vector.load %arg3[%c0_5, %c0_6] : memref<24x512xf32, #tpu.memory_space<vmem>>, vector<24x512xf32>
    tpu.vector_store %arg3[%c0_5, %c0_6], %13 {strides = array<i32>} : memref<24x512xf32, #tpu.memory_space<vmem>>, vector<24x512xf32>,
    return
  }
  func.func @transform_0(%arg0: i32) -> (i32, i32) {
    %c0_i32 = arith.constant 0 : i32
    %c0_i32_0 = arith.constant 0 : i32
    return %arg0, %c0_i32 : i32, i32
  }
  func.func @transform_1(%arg0: i32) -> (i32, i32) {
    %c0_i32 = arith.constant 0 : i32
    %c0_i32_0 = arith.constant 0 : i32
    %c0_i32_1 = arith.constant 0 : i32
    return %c0_i32, %c0_i32_0 : i32, i32
  }
  func.func @transform_2(%arg0: i32) -> (i32, i32) {
    %c0_i32 = arith.constant 0 : i32
    %c0_i32_0 = arith.constant 0 : i32
    return %arg0, %c0_i32 : i32, i32
  }
}

</mosaic_0001>

<bundles_post_ra>
// kernel: tpu_custom_call.1
= control target key start
LH: loop header
LB: loop body
LE: loop exit
PB: predicated region body
PF: predicated region fallthrough
CT: control target
= control target key end

     0   :  { %7 = vsyncpa [#allocation3], 0  ;;  %s294_s0 = inlined_call_operand.hbm [shape: f32[22,512], index: 0, kind: input, shape index: {}]   ;;  %s295_s1 = inlined_call_operand.hbm [shape: f32[1,512], index: 1, kind: input, shape index: {}]   ;;  %s296_s2 = inlined_call_operand.hbm [shape: f32[22,512], index: 2, kind: output, shape index: {}]  }
   0x1   :  { %8 = vsyncpa [#allocation6], 0 }
   0x2   :  { %9 = vsyncpa [#allocation4], 0  ;;  %s239_s9 = smov [#allocation2]  }
   0x3   :  { %s15_s10 = sshll.u32 %s239_s9, 4  ;;  %s16_s10 = int_to_ptr.vmem [resolvable:$true] %s15_s10 }
   0x4   :  { %s181_s11 = scalar_lea.vmem %s16_s10, 1536  ;;  %p186_p1 = scmp.lt.s32.totalorder %s16_s10, %s16_s10 }
   0x5   :  { %p182_p0 = scmp.ne.s32.totalorder %s16_s10, %s181_s11  ;;  %p187_p2 = scmp.lt.s32.totalorder %s181_s11, %s181_s11 }
   0x7   :  { %p188_p3 = por %p187_p2, %p186_p1 }
   0x9   :  { %p189_p4 = pnand %p188_p3, %p182_p0 }
   0xb   :  { %192 = shalt.err (!%p189_p4)
}
   0xc   :  { %s240_s12 = smov 512   ;;  %s241_s13 = smov 32  }
   0xd   :  { %21 = dma.hbm_to_vmem [thread:$0]  %s294_s0, 1536, %s16_s10, [#allocation3], %s240_s12, %s240_s12, %s241_s13  }
   0xe   :  { %s242_s16 = smov [#allocation5]  }
   0xf   :  { %s28_s17 = sshll.u32 %s242_s16, 4  ;;  %s29_s17 = int_to_ptr.vmem [resolvable:$true] %s28_s17 }
  0x10   :  { %s201_s18 = scalar_lea.vmem %s29_s17, 64  ;;  %p206_p6 = scmp.lt.s32.totalorder %s29_s17, %s29_s17 }
  0x11   :  { %p202_p5 = scmp.ne.s32.totalorder %s29_s17, %s201_s18  ;;  %p207_p7 = scmp.lt.s32.totalorder %s201_s18, %s201_s18 }
  0x13   :  { %p208_p8 = por %p207_p7, %p206_p6 }
  0x15   :  { %p209_p9 = pnand %p208_p8, %p202_p5 }
  0x17   :  { %212 = shalt.err (!%p209_p9)
}
  0x18   :  { %31 = dma.hbm_to_vmem [thread:$0]  %s295_s1, 64, %s29_s17, [#allocation6]  }
  0x19   :  { %233 = dma.done.wait [#allocation3], 1536  }
  0x1a   :  { %234 = vsyncadd [#allocation3], 4294965760 }
  0x1b   :  { %235 = dma.done.wait [#allocation6], 64  }
  0x1c   :  { %236 = vsyncadd [#allocation6], 4294967232  ;;  %v38_v0 = vld [vmem:[#allocation2] sm:$0xff]  ;;  %v39_v1 = vld [vmem:[#allocation2 + $0x8] sm:$0xff]  ;;  %v100_v41 = vlaneseq  ;;  %s243_s0 = smov [#allocation7]  }
  0x1d   :  { %v40_v2 = vld [vmem:[#allocation2 + $0x10] sm:$0xff]  ;;  %v41_v3 = vld [vmem:[#allocation2 + $0x18] sm:$0xff]  ;;  %v50_v4 = vmul.f32 %v38_v0, %v38_v0  ;;  %v51_v5 = vmul.f32 %v39_v1, %v39_v1  ;;  %v46_v7 = vld [vmem:[#allocation2 + $0x40] sm:$0xff]  ;;  %s149_s1 = sshll.u32 %s243_s0, 4  ;;  %s150_s1 = int_to_ptr.vmem [resolvable:$true] %s149_s1 }
  0x1e   :  { %v52_v6 = vmul.f32 %v40_v2, %v40_v2  ;;  %v47_v8 = vld [vmem:[#allocation2 + $0x48] sm:$0xff]  ;;  %v48_v9 = vld [vmem:[#allocation2 + $0x50] sm:$0xff]  ;;  %v49_v10 = vld [vmem:[#allocation2 + $0x58] sm:$0xff]  ;;  %v58_v11 = vmul.f32 %v46_v7, %v46_v7  ;;  %v53_v14 = vmul.f32 %v41_v3, %v41_v3  ;;  %v101_v43 = vshrl.u32 %v100_v41, 7  ;;  %s213_s21 = scalar_lea.vmem %s150_s1, 1536  ;;  %p218_p11 = scmp.lt.s32.totalorder %s150_s1, %s150_s1 }
  0x1f   :  { %v59_v12 = vmul.f32 %v47_v8, %v47_v8  ;;  %v268_v13 = vld [vmem:[#allocation2 + $0x20] sm:$0xff]  ;;  %v62_v15 = vadd.f32 %v51_v5, %v50_v4  ;;  %v60_v16 = vmul.f32 %v48_v9, %v48_v9  ;;  %v270_v17 = vld [vmem:[#allocation2 + $0x28] sm:$0xff]  ;;  %v272_v18 = vld [vmem:[#allocation2 + $0x30] sm:$0xff]  ;;  %v61_v21 = vmul.f32 %v49_v10, %v49_v10  ;;  %p214_p10 = scmp.ne.s32.totalorder %s150_s1, %s213_s21  ;;  %p219_p12 = scmp.lt.s32.totalorder %s213_s21, %s213_s21 }
  0x20   :  { %v274_v19 = vld [vmem:[#allocation2 + $0x38] sm:$0xff]  ;;  %v54_v20 = vmul.f32 %v268_v13, %v268_v13  ;;  %v55_v23 = vmul.f32 %v270_v17, %v270_v17  ;;  %v56_v24 = vmul.f32 %v272_v18, %v272_v18  ;;  %v102_v44 = vsub.s32 0, %v101_v43  ;;  %v98_v48 = vld [vmem:[#allocation5] sm:$0xf] }
  0x21   :  { %v72_v22 = vadd.f32 %v59_v12, %v58_v11  ;;  %v63_v25 = vadd.f32 %v62_v15, %v52_v6  ;;  %v57_v27 = vmul.f32 %v274_v19, %v274_v19  ;;  %v106_v45 = vsub.s32 1, %v101_v43  ;;  %p220_p13 = por %p219_p12, %p218_p11 }
  0x22   :  { %v67_v28 = vadd.f32 %v55_v23, %v54_v20  ;;  %v110_v46 = vsub.s32 2, %v101_v43  ;;  %v114_v47 = vsub.s32 3, %v101_v43  ;;  %v103_v49 = vrot.slane %v98_v48, %v102_v44 }
  0x23   :  { %v73_v26 = vadd.f32 %v72_v22, %v60_v16  ;;  %v64_v29 = vadd.f32 %v63_v25, %v53_v14  ;;  %v107_v50 = vrot.slane %v98_v48, %v106_v45  ;;  %p221_p0 = pnand %p220_p13, %p214_p10 }
  0x24   :  { %v68_v31 = vadd.f32 %v67_v28, %v56_v24  ;;  %v111_v51 = vrot.slane %v98_v48, %v110_v46  ;;  %v115_v52 = vrot.slane %v98_v48, %v114_v47 }
  0x25   :  { %v74_v30 = vadd.f32 %v73_v26, %v61_v21  ;;  %65 = vadd.xlane.f32.xlu0 %v64_v29 }
  0x26   :  { %v69_v32 = vadd.f32 %v68_v31, %v57_v27 }
  0x27   :  { %75 = vadd.xlane.f32.xlu1 %v74_v30 }
  0x29   :  { %70 = vadd.xlane.f32.xlu0 %v69_v32 }
  0xae   :  { %v66_v33 = vpop.xlane.xlu0 %65 }
  0xaf   :  { %v77_v34 = vmul.f32 0.001953125, %v66_v33 }
  0xb0   :  { %v76_v35 = vpop.xlane.xlu1 %75 }
  0xb1   :  { %v79_v36 = vmul.f32 0.001953125, %v76_v35  ;;  %v80_v37 = vadd.f32 1e-05, %v77_v34 }
  0xb2   :  { %v71_v39 = vpop.xlane.xlu0 %70 }
  0xb3   :  { %v82_v38 = vadd.f32 1e-05, %v79_v36  ;;  %167 = vrsqrt.f32 %v80_v37  ;;  %v78_v40 = vmul.f32 0.001953125, %v71_v39 }
  0xb5   :  { %169 = vrsqrt.f32 %v82_v38  ;;  %v81_v42 = vadd.f32 1e-05, %v78_v40 }
  0xb7   :  { %171 = vrsqrt.f32 %v81_v42 }
  0xc0   :  { %v168_v53 = vpop.eup %167 }
  0xc1   :  { %v86_v55 = vmul.f32 %v168_v53, %v38_v0  ;;  %v87_v56 = vmul.f32 %v168_v53, %v39_v1  ;;  %v88_v57 = vmul.f32 %v168_v53, %v40_v2  ;;  %v89_v58 = vmul.f32 %v168_v53, %v41_v3 }
  0xc2   :  { %v170_v54 = vpop.eup %169 }
  0xc3   :  { %v94_v59 = vmul.f32 %v170_v54, %v46_v7  ;;  %v95_v60 = vmul.f32 %v170_v54, %v47_v8  ;;  %v96_v61 = vmul.f32 %v170_v54, %v48_v9  ;;  %v97_v62 = vmul.f32 %v170_v54, %v49_v10 }
  0xc4   :  { %v120_v63 = vmul.f32 %v103_v49, %v86_v55  ;;  %v121_v4 = vmul.f32 %v107_v50, %v87_v56  ;;  %v122_v5 = vmul.f32 %v111_v51, %v88_v57  ;;  %v123_v6 = vmul.f32 %v115_v52, %v89_v58  ;;  %v172_v11 = vpop.eup %171 }
  0xc5   :  { %v128_v12 = vmul.f32 %v103_v49, %v94_v59  ;;  %v129_v14 = vmul.f32 %v107_v50, %v95_v60  ;;  %v130_v15 = vmul.f32 %v111_v51, %v96_v61  ;;  %v131_v16 = vmul.f32 %v115_v52, %v97_v62 }
  0xc6   :  { %v90_v0 = vmul.f32 %v172_v11, %v268_v13  ;;  %v91_v1 = vmul.f32 %v172_v11, %v270_v17  ;;  %v92_v2 = vmul.f32 %v172_v11, %v272_v18  ;;  %v93_v3 = vmul.f32 %v172_v11, %v274_v19  ;;  %132 = vst [vmem:[#allocation7] sm:$0xff] %v120_v63 }
  0xc7   :  { %133 = vst [vmem:[#allocation7 + $0x8] sm:$0xff] %v121_v4  ;;  %134 = vst [vmem:[#allocation7 + $0x10] sm:$0xff] %v122_v5 }
  0xc8   :  { %135 = vst [vmem:[#allocation7 + $0x18] sm:$0xff] %v123_v6  ;;  %140 = vst [vmem:[#allocation7 + $0x40] sm:$0xff] %v128_v12  ;;  %v124_v7 = vmul.f32 %v103_v49, %v90_v0  ;;  %v125_v8 = vmul.f32 %v107_v50, %v91_v1  ;;  %v126_v9 = vmul.f32 %v111_v51, %v92_v2 }
  0xc9   :  { %141 = vst [vmem:[#allocation7 + $0x48] sm:$0xff] %v129_v14  ;;  %142 = vst [vmem:[#allocation7 + $0x50] sm:$0xff] %v130_v15  ;;  %v127_v10 = vmul.f32 %v115_v52, %v93_v3 }
  0xca   :  { %143 = vst [vmem:[#allocation7 + $0x58] sm:$0xff] %v131_v16  ;;  %136 = vst [vmem:[#allocation7 + $0x20] sm:$0xff] %v124_v7 }
  0xcb   :  { %137 = vst [vmem:[#allocation7 + $0x28] sm:$0xff] %v125_v8  ;;  %138 = vst [vmem:[#allocation7 + $0x30] sm:$0xff] %v126_v9 }
  0xcc   :  { %139 = vst [vmem:[#allocation7 + $0x38] sm:$0xff] %v127_v10 }
  0xcd   :  { %224 = shalt.err (!%p221_p0)
}
  0xce   :  { %155 = dma.vmem_to_hbm [thread:$0]  %s150_s1, 1536, %s296_s2, [#allocation4], %s240_s12, %s240_s12, %s241_s13  }
  0xcf   :  { %237 = dma.done.wait [#allocation4], 1536  }
  0xd0   :  { %238 = vsyncadd [#allocation4], 4294965760 }
  0xd1   :  { %159 = vsyncpa [#allocation3], 1 }
  0xd2   :  { %160 = vsyncpa [#allocation6], 1 }
  0xd3   :  { %161 = vsyncpa [#allocation4], 1 }

</bundles_post_ra>
